<compile_context>
chip_gen: v5e
topology: v5e:2x2
jax: 0.10.0
libtpu: 0.0.40
codegen_flags: <defaults>
</compile_context>

<pallas_src>
import functools

import jax
import jax.numpy as jnp
from jax.experimental import pallas as pl
from jax.experimental.pallas import tpu as pltpu


def _mlp_clf_kernel(x_ref, w_ref, b_ref, o_ref):
    # BN(eval) already folded into w/b; dropout(eval) is identity.
    x = x_ref[...]
    if x.dtype != jnp.bfloat16:          # static (trace-time) branch
        x = x.astype(jnp.bfloat16)
    acc = jnp.dot(x, w_ref[...], preferred_element_type=jnp.float32) + b_ref[...]
    o_ref[...] = acc.astype(o_ref.dtype)  # lane-dense (TB, 128) bf16 store


def prepare_params(gamma, beta, running_mean, running_var, weight, bias, eps=1e-5):
    """One-time parameter prep: fold BN(eval) into the linear, transpose,
    pad the class dim up to a multiple of 128, cast the weight to bf16.

    weight: (C, F) PyTorch nn.Linear layout; bias: (C,)
    returns w_pad (F, Cpad) bf16, b_pad (1, Cpad) f32
    """
    C, F = weight.shape
    inv_std = 1.0 / jnp.sqrt(running_var.astype(jnp.float32) + eps)
    scale = gamma.astype(jnp.float32) * inv_std                              # (F,)
    shift = beta.astype(jnp.float32) - running_mean.astype(jnp.float32) * scale

    w_t = weight.T.astype(jnp.float32)                 # (F, C)
    w_fold = scale[:, None] * w_t                      # (F, C)
    b_fold = bias.astype(jnp.float32) + shift @ w_t    # (C,)

    c_pad = max(128, -(-C // 128) * 128)
    w_pad = (
        jnp.zeros((F, c_pad), jnp.bfloat16)
        .at[:, :C]
        .set(w_fold.astype(jnp.bfloat16))
    )
    b_pad = jnp.zeros((1, c_pad), jnp.float32).at[:, :C].set(b_fold)
    return w_pad, b_pad


def _round_up(n, m):
    return -(-n // m) * m


def _choose_tb(batch):
    # Max 2048 rows/tile: bf16 x tile 2 MiB + bf16 out tile 0.5 MiB,
    # double-buffered ~5 MiB + 128 KiB weight -> fits every generation's
    # default scoped-VMEM limit (v5e 16 MiB, v6e/v7x 32 MiB) without flags.
    tb = min(2048, _round_up(batch, 8))
    # Ensure >=2 parallel grid steps when the batch can be split, so v7x's
    # two TensorCores both get work (no effect on single-TC v5e/v6e beyond
    # ~0.35 us of extra per-step overhead).
    if batch >= 16 and pl.cdiv(batch, tb) < 2:
        tb = _round_up(pl.cdiv(batch, 2), 8)
    return tb


@jax.jit
def mlp_clf_forward_padded(ftrs, w_pad, b_pad):
    """Hot path: fused (BN-folded) Linear  (B, F) @ (F, Cpad) + bias.

    Returns the padded (B, Cpad) bf16 logits block; the consumer slices the
    real classes lazily (keeps the slice copy out of the hot path).
    """
    B, F = ftrs.shape
    c_pad = w_pad.shape[1]
    TB = _choose_tb(B)
    grid = pl.cdiv(B, TB)  # ragged last tile handled by Pallas; no jnp.pad

    flops = 2 * B * F * c_pad
    bytes_accessed = (
        B * F * ftrs.dtype.itemsize
        + F * c_pad * w_pad.dtype.itemsize
        + c_pad * b_pad.dtype.itemsize
        + B * c_pad * 2  # bf16 output
    )

    return pl.pallas_call(
        _mlp_clf_kernel,
        out_shape=jax.ShapeDtypeStruct((B, c_pad), jnp.bfloat16),
        grid_spec=pltpu.PrefetchScalarGridSpec(
            num_scalar_prefetch=0,
            grid=(grid,),
            in_specs=[
                pl.BlockSpec((TB, F), lambda i: (i, 0)),      # x tile (bf16)
                pl.BlockSpec((F, c_pad), lambda i: (0, 0)),   # folded weight (resident)
                pl.BlockSpec((1, c_pad), lambda i: (0, 0)),   # folded bias   (resident)
            ],
            out_specs=pl.BlockSpec((TB, c_pad), lambda i: (i, 0)),
        ),
        compiler_params=pltpu.CompilerParams(
            dimension_semantics=("parallel",),
        ),
        cost_estimate=pl.CostEstimate(
            flops=flops, transcendentals=0, bytes_accessed=bytes_accessed
        ),
    )(ftrs, w_pad, b_pad)


def mlp_clf_forward(ftrs, w_pad, b_pad, num_classes):
    """Convenience wrapper matching the module's (B, num_classes) output.
    The slice happens at the consumer, outside the jitted kernel hot path."""
    return mlp_clf_forward_padded(ftrs, w_pad, b_pad)[:, :num_classes]


if __name__ == "__main__":
    # Module config (consistent with __init__):
    #   resnet='resnet18' -> num_ftrs = 512*2 = 1024
    #   num_mags=2        -> fc_in = 2*1024//4 = 512
    num_mags = 2
    num_ftrs = 512 * 2
    fc_in = num_mags * num_ftrs // 4   # 512
    num_classes = 10
    batch = 8

    key = jax.random.PRNGKey(0)
    k_x, k_g, k_b, k_m, k_v, k_w, k_bias = jax.random.split(key, 7)

    # Features arrive in bf16 (cast once where they are produced, upstream of
    # the classifier) -> dominant kernel input DMA is half-width.
    ftrs = jax.random.normal(k_x, (batch, fc_in), dtype=jnp.float32).astype(
        jnp.bfloat16
    )

    gamma = 1.0 + 0.1 * jax.random.normal(k_g, (fc_in,), dtype=jnp.float32)
    beta = 0.1 * jax.random.normal(k_b, (fc_in,), dtype=jnp.float32)
    running_mean = 0.1 * jax.random.normal(k_m, (fc_in,), dtype=jnp.float32)
    running_var = jnp.abs(
        1.0 + 0.1 * jax.random.normal(k_v, (fc_in,), dtype=jnp.float32)
    )
    weight = (
        jax.random.normal(k_w, (num_classes, fc_in), dtype=jnp.float32)
        / jnp.sqrt(fc_in)
    )
    bias = 0.01 * jax.random.normal(k_bias, (num_classes,), dtype=jnp.float32)

    # One-time parameter prep (hoisted out of the hot path).
    w_pad, b_pad = prepare_params(
        gamma, beta, running_mean, running_var, weight, bias
    )
    w_pad, b_pad = jax.block_until_ready((w_pad, b_pad))

    # Hot path: padded (B, 128) bf16 logits; slice at the consumer.
    out_pad = jax.block_until_ready(mlp_clf_forward_padded(ftrs, w_pad, b_pad))
    out = out_pad[:, :num_classes]

    # Pure-JAX f32 reference on the same bf16 features (tolerance covers
    # bf16 folded-weight + bf16 output rounding; accumulation is f32).
    x_f32 = ftrs.astype(jnp.float32)
    inv_std = 1.0 / jnp.sqrt(running_var + 1e-5)
    xn_ref = (x_f32 - running_mean) * inv_std * gamma + beta
    out_ref = xn_ref @ weight.T + bias

    assert out.shape == (batch, num_classes)
    assert jnp.allclose(out.astype(jnp.float32), out_ref, atol=5e-2, rtol=5e-2), (
        float(jnp.max(jnp.abs(out.astype(jnp.float32) - out_ref)))
    )

    print("KERNEL_OK")
</pallas_src>

<mosaic_0001>
module attributes {stable_mosaic.version = 11 : i64} {
  func.func @_mlp_clf_kernel(%arg0: i32, %arg1: memref<8x512xbf16, #tpu.memory_space<vmem>>, %arg2: memref<512x128xbf16, #tpu.memory_space<vmem>>, %arg3: memref<1x128xf32, #tpu.memory_space<vmem>>, %arg4: memref<8x128xbf16, #tpu.memory_space<vmem>>) attributes {dimension_semantics = [#tpu.dimension_semantics<parallel>], iteration_bounds = array<i64: 1>, scalar_prefetch = 0 : i64, scratch_operands = 0 : i64, tpu.core_type = #tpu.core_type<tc>, window_params = [{transform_indices = @transform_0, window_bounds = array<i64: 8, 512>}, {pipeline_mode = #tpu.pipeline_mode<synchronous>, transform_indices = @transform_1, window_bounds = array<i64: 512, 128>}, {pipeline_mode = #tpu.pipeline_mode<synchronous>, transform_indices = @transform_2, window_bounds = array<i64: 1, 128>}, {transform_indices = @transform_3, window_bounds = array<i64: 8, 128>}]} {
    %c0 = arith.constant 0 : index
    %c0_0 = arith.constant 0 : index
    %0 = vector.load %arg1[%c0, %c0_0] : memref<8x512xbf16, #tpu.memory_space<vmem>>, vector<8x512xbf16>
    %c0_1 = arith.constant 0 : index
    %c0_2 = arith.constant 0 : index
    %1 = vector.load %arg2[%c0_1, %c0_2] : memref<512x128xbf16, #tpu.memory_space<vmem>>, vector<512x128xbf16>
    %cst = arith.constant dense<0.000000e+00> : vector<8x128xf32>
    %2 = tpu.matmul %0, %1, %cst {dimension_numbers = #tpu.dot_dimension_numbers<[1], [0], [0], [1], [0, 0, 1, 1], [], []>} : vector<8x512xbf16>, vector<512x128xbf16>, vector<8x128xf32> -> vector<8x128xf32>
    %c0_3 = arith.constant 0 : index
    %c0_4 = arith.constant 0 : index
    %3 = vector.load %arg3[%c0_3, %c0_4] : memref<1x128xf32, #tpu.memory_space<vmem>>, vector<1x128xf32>
    %4 = vector.broadcast %3 : vector<1x128xf32> to vector<8x128xf32>
    %5 = arith.addf %2, %4 : vector<8x128xf32>
    %6 = arith.truncf %5 : vector<8x128xf32> to vector<8x128xbf16>
    %c0_5 = arith.constant 0 : index
    %c0_6 = arith.constant 0 : index
    %7 = vector.load %arg4[%c0_5, %c0_6] : memref<8x128xbf16, #tpu.memory_space<vmem>>, vector<8x128xbf16>
    tpu.vector_store %arg4[%c0_5, %c0_6], %6 {strides = array<i32>} : memref<8x128xbf16, #tpu.memory_space<vmem>>, vector<8x128xbf16>,
    return
  }
  func.func @transform_0(%arg0: i32) -> (i32, i32) {
    %c0_i32 = arith.constant 0 : i32
    %c0_i32_0 = arith.constant 0 : i32
    return %arg0, %c0_i32 : i32, i32
  }
  func.func @transform_1(%arg0: i32) -> (i32, i32) {
    %c0_i32 = arith.constant 0 : i32
    %c0_i32_0 = arith.constant 0 : i32
    %c0_i32_1 = arith.constant 0 : i32
    return %c0_i32, %c0_i32_0 : i32, i32
  }
  func.func @transform_2(%arg0: i32) -> (i32, i32) {
    %c0_i32 = arith.constant 0 : i32
    %c0_i32_0 = arith.constant 0 : i32
    %c0_i32_1 = arith.constant 0 : i32
    return %c0_i32, %c0_i32_0 : i32, i32
  }
  func.func @transform_3(%arg0: i32) -> (i32, i32) {
    %c0_i32 = arith.constant 0 : i32
    %c0_i32_0 = arith.constant 0 : i32
    return %arg0, %c0_i32 : i32, i32
  }
}

</mosaic_0001>

<bundles_post_ra>
// kernel: mlp_clf_forward_padded.1
= control target key start
LH: loop header
LB: loop body
LE: loop exit
PB: predicated region body
PF: predicated region fallthrough
CT: control target
= control target key end

     0   :  { %8 = vsyncpa [#allocation3], 0  ;;  %s674_s0 = inlined_call_operand.hbm [shape: bf16[8,512], index: 0, kind: input, shape index: {}]   ;;  %s675_s1 = inlined_call_operand.hbm [shape: bf16[512,128], index: 1, kind: input, shape index: {}]   ;;  %s676_s2 = inlined_call_operand.vmem [shape: f32[1,128], index: 2, kind: input, shape index: {}]   ;;  %s677_s3 = inlined_call_operand.hbm [shape: bf16[8,128], index: 3, kind: output, shape index: {}]  }
   0x1   :  { %9 = vsyncpa [#allocation6], 0 }
   0x2   :  { %10 = vsyncpa [#allocation4], 0  ;;  %s16_s14 = sshll.u32 %s674_s0, 4  ;;  %s637_s15 = smov [#allocation2]   ;;  %s17_s14 = int_to_ptr.hbm [resolvable:$true] %s16_s14 }
   0x3   :  { %s18_s16 = sshll.u32 %s637_s15, 4  ;;  %s26_s19 = sshll.u32 %s675_s1, 4  ;;  %s19_s16 = int_to_ptr.vmem [resolvable:$true] %s18_s16  ;;  %s27_s19 = int_to_ptr.hbm [resolvable:$true] %s26_s19 }
   0x4   :  { %21 = dma.hbm_to_vmem [thread:$0]  %s17_s14, 256, %s19_s16, [#allocation3]  }
   0x5   :  { %s638_s20 = smov [#allocation5]   ;;  %s639_s22 = smov 64  }
   0x6   :  { %s28_s21 = sshll.u32 %s638_s20, 4  ;;  %s640_s23 = smov 4   ;;  %s29_s21 = int_to_ptr.vmem [resolvable:$true] %s28_s21 }
   0x7   :  { %34 = dma.hbm_to_vmem [thread:$0]  %s27_s19, 4096, %s29_s21, [#allocation6], %s639_s22, %s639_s22, %s640_s23  }
   0x8   :  { %631 = dma.done.wait [#allocation3], 256  }
   0x9   :  { %632 = vsyncadd [#allocation3], 4294967040 }
   0xa   :  { %633 = dma.done.wait [#allocation6], 4096  }
   0xb   :  { %634 = vsyncadd [#allocation6], 4294963200  ;;  %v528_v0 = vld [vmem:[#allocation5 + $0x38] sm:$0xff]  ;;  %v527_v4 = vld [vmem:[#allocation5 + $0x30] sm:$0xff]  ;;  %s641_s24 = smov [#allocation7]   ;;  %s382_s28 = sshll.u32 %s677_s3, 4  ;;  %s383_s28 = int_to_ptr.hbm [resolvable:$true] %s382_s28 }
   0xc   :  { %v536_v1 = vld [vmem:[#allocation5 + $0x78] sm:$0xff]  ;;  %321 = vmatpush.bf16.msra.mxu0 %v528_v0  ;;  %v535_v5 = vld [vmem:[#allocation5 + $0x70] sm:$0xff]  ;;  %v526_v8 = vld [vmem:[#allocation5 + $0x28] sm:$0xff]  ;;  %s380_s25 = sshll.u32 %s641_s24, 4  ;;  %s381_s25 = int_to_ptr.vmem [resolvable:$true] %s380_s25 }
   0xd   :  { %v544_v2 = vld [vmem:[#allocation5 + $0xb8] sm:$0xff]  ;;  %334 = vmatpush.bf16.msra.mxu1 %v536_v1  ;;  %v543_v6 = vld [vmem:[#allocation5 + $0xb0] sm:$0xff]  ;;  %v534_v9 = vld [vmem:[#allocation5 + $0x68] sm:$0xff] }
   0xe   :  { %v552_v3 = vld [vmem:[#allocation5 + $0xf8] sm:$0xff]  ;;  %347 = vmatpush.bf16.msra.mxu2 %v544_v2  ;;  %v551_v7 = vld [vmem:[#allocation5 + $0xf0] sm:$0xff]  ;;  %v542_v10 = vld [vmem:[#allocation5 + $0xa8] sm:$0xff] }
   0xf   :  { %360 = vmatpush.bf16.msra.mxu3 %v552_v3  ;;  %v550_v11 = vld [vmem:[#allocation5 + $0xe8] sm:$0xff]  ;;  %v525_v12 = vld [vmem:[#allocation5 + $0x20] sm:$0xff]  ;;  %v524_v16 = vld [vmem:[#allocation5 + $0x18] sm:$0xff] }
  0x10   :  { %322 = vmatpush.bf16.msra.mxu0 %v527_v4  ;;  %v533_v13 = vld [vmem:[#allocation5 + $0x60] sm:$0xff]  ;;  %v532_v17 = vld [vmem:[#allocation5 + $0x58] sm:$0xff]  ;;  %v523_v20 = vld [vmem:[#allocation5 + $0x10] sm:$0xff] }
  0x11   :  { %335 = vmatpush.bf16.msra.mxu1 %v535_v5  ;;  %v541_v14 = vld [vmem:[#allocation5 + $0xa0] sm:$0xff]  ;;  %v540_v18 = vld [vmem:[#allocation5 + $0x98] sm:$0xff]  ;;  %v531_v21 = vld [vmem:[#allocation5 + $0x50] sm:$0xff] }
  0x12   :  { %348 = vmatpush.bf16.msra.mxu2 %v543_v6  ;;  %v549_v15 = vld [vmem:[#allocation5 + $0xe0] sm:$0xff]  ;;  %v548_v19 = vld [vmem:[#allocation5 + $0xd8] sm:$0xff]  ;;  %v539_v22 = vld [vmem:[#allocation5 + $0x90] sm:$0xff] }
  0x13   :  { %361 = vmatpush.bf16.msra.mxu3 %v551_v7  ;;  %v547_v23 = vld [vmem:[#allocation5 + $0xd0] sm:$0xff]  ;;  %v522_v24 = vld [vmem:[#allocation5 + $0x8] sm:$0xff]  ;;  %v46_v29 = vld [vmem:[#allocation2 + $0x8] sm:$0xff] }
  0x14   :  { %323 = vmatpush.bf16.msra.mxu0 %v526_v8  ;;  %v530_v25 = vld [vmem:[#allocation5 + $0x48] sm:$0xff]  ;;  %v45_v26 = vld [vmem:[#allocation2] sm:$0xff]  ;;  %v521_v32 = vld [vmem:[#allocation5] sm:$0xff]  ;;  %v119_v34 = vunpack.c.l.b16 %v46_v29  ;;  %v120_v35 = vunpack.c.h.b16 %v46_v29 }
  0x15   :  { %336 = vmatpush.bf16.msra.mxu1 %v534_v9  ;;  %v538_v27 = vld [vmem:[#allocation5 + $0x88] sm:$0xff]  ;;  %v117_v30 = vunpack.c.l.b16 %v45_v26  ;;  %v118_v31 = vunpack.c.h.b16 %v45_v26  ;;  %v529_v33 = vld [vmem:[#allocation5 + $0x40] sm:$0xff]  ;;  %v558_v42 = vld [vmem:[%s676_s2] ss:$0 sm:$0xff] }
  0x16   :  { %349 = vmatpush.bf16.msra.mxu2 %v542_v10  ;;  %v546_v28 = vld [vmem:[#allocation5 + $0xc8] sm:$0xff]  ;;  %v537_v36 = vld [vmem:[#allocation5 + $0x80] sm:$0xff]  ;;  %v123_v40 = vpack.c.b16 %v119_v34, %v119_v34  ;;  %v124_v41 = vpack.c.b16 %v120_v35, %v120_v35 }
  0x17   :  { %362 = vmatpush.bf16.msra.mxu3 %v550_v11  ;;  %v545_v37 = vld [vmem:[#allocation5 + $0xc0] sm:$0xff]  ;;  %v121_v38 = vpack.c.b16 %v117_v30, %v117_v30  ;;  %v122_v39 = vpack.c.b16 %v118_v31, %v118_v31 }
  0x18   :  { %324 = vmatpush.bf16.msra.mxu0 %v525_v12 }
  0x19   :  { %337 = vmatpush.bf16.msra.mxu1 %v533_v13 }
  0x1a   :  { %350 = vmatpush.bf16.msra.mxu2 %v541_v14 }
  0x1b   :  { %363 = vmatpush.bf16.msra.mxu3 %v549_v15 }
  0x1c   :  { %325 = vmatpush.bf16.msra.mxu0 %v524_v16 }
  0x1d   :  { %338 = vmatpush.bf16.msra.mxu1 %v532_v17 }
  0x1e   :  { %351 = vmatpush.bf16.msra.mxu2 %v540_v18 }
  0x1f   :  { %364 = vmatpush.bf16.msra.mxu3 %v548_v19 }
  0x20   :  { %326 = vmatpush.bf16.msra.mxu0 %v523_v20 }
  0x21   :  { %339 = vmatpush.bf16.msra.mxu1 %v531_v21 }
  0x22   :  { %352 = vmatpush.bf16.msra.mxu2 %v539_v22 }
  0x23   :  { %365 = vmatpush.bf16.msra.mxu3 %v547_v23 }
  0x24   :  { %327 = vmatpush.bf16.msra.mxu0 %v522_v24 }
  0x25   :  { %340 = vmatpush.bf16.msra.mxu1 %v530_v25 }
  0x26   :  { %353 = vmatpush.bf16.msra.mxu2 %v538_v27 }
  0x27   :  { %366 = vmatpush.bf16.msra.mxu3 %v546_v28 }
  0x28   :  { %328 = vmatpush.bf16.msra.mxu0 %v521_v32 }
  0x29   :  { %341 = vmatpush.bf16.msra.mxu1 %v529_v33 }
  0x2a   :  { %354 = vmatpush.bf16.msra.mxu2 %v537_v36 }
  0x2b   :  { %367 = vmatpush.bf16.msra.mxu3 %v545_v37  ;;  %329 = vmatmul.bf16.vlgmr.msra.gmra.mxu0 %v121_v38 }
  0x2c   :  { %342 = vmatmul.bf16.vlgmr.msra.gmra.mxu1 %v122_v39 }
  0x2d   :  { %355 = vmatmul.bf16.vlgmr.msra.gmra.mxu2 %v123_v40 }
  0x2e   :  { %368 = vmatmul.bf16.vlgmr.msra.gmra.mxu3 %v124_v41 }
  0xa8   :  { %v330_v43 = vpop.f32.mrf.mxu0 }
  0xa9   :  { %v343_v44 = vpop.f32.mrf.mxu1  ;;  %v331_v45 = vadd.f32 %v558_v42, %v330_v43 }
  0xab   :  { %v344_v46 = vadd.f32 %v343_v44, %v331_v45 }
  0xb0   :  { %v356_v47 = vpop.f32.mrf.mxu2  ;;  %v332_v50 = vpop.f32.mrf.mxu0 }
  0xb1   :  { %v369_v48 = vpop.f32.mrf.mxu3  ;;  %v357_v49 = vadd.f32 %v356_v47, %v344_v46  ;;  %v345_v51 = vpop.f32.mrf.mxu1 }
  0xb3   :  { %v370_v52 = vadd.f32 %v369_v48, %v357_v49 }
  0xb5   :  { %v373_v53 = vpack.c.bf16 %v370_v52, %v370_v52 }
  0xb7   :  { %374 = vst [vmem:[#allocation7] sm:$0xf] %v373_v53 }
  0xb8   :  { %v358_v54 = vpop.f32.mrf.mxu2  ;;  %385 = dma.vmem_to_hbm [thread:$0]  %s381_s25, 64, %s383_s28, [#allocation4]  }
  0xb9   :  { %v371_v55 = vpop.f32.mrf.mxu3 }
  0xba   :  { %635 = dma.done.wait [#allocation4], 64  }
  0xbb   :  { %636 = vsyncadd [#allocation4], 4294967232 }
  0xbc   :  { %390 = vsyncpa [#allocation3], 1 }
  0xbd   :  { %391 = vsyncpa [#allocation6], 1 }
  0xbe   :  { %392 = vsyncpa [#allocation4], 1 }

</bundles_post_ra>
